<compile_context>
chip_gen: v6e
topology: v6e:2x2x1
jax: 0.10.0
libtpu: 0.0.40
codegen_flags: <defaults>
</compile_context>

<pallas_src>
import functools

import jax
import jax.numpy as jnp
from jax import lax
from jax.experimental import pallas as pl
from jax.experimental.pallas import tpu as pltpu


# ---------------------------------------------------------------------------
# Kernels
# ---------------------------------------------------------------------------
def _pnorm_dist_kernel(x1_ref, x2_ref, o_ref, acc_ref, *, p, eps, valid_cols, block_cols):
    """PairwiseDistance (p=1 or p=2) over the feature axis, tiled over (rows, features)."""
    j = pl.program_id(1)

    @pl.when(j == 0)
    def _init():
        acc_ref[...] = jnp.zeros_like(acc_ref)

    a = x1_ref[...].astype(jnp.float32)
    b = x2_ref[...].astype(jnp.float32)
    diff = a - b + eps  # PyTorch adds eps to the difference before taking the norm.
    if valid_cols % block_cols != 0:
        # Static check: only mask when the wrapper zero-padded the feature dim,
        # otherwise the +eps on padded columns would perturb the norm.
        col = j * block_cols + lax.broadcasted_iota(jnp.int32, diff.shape, 1)
        diff = jnp.where(col < valid_cols, diff, 0.0)

    if p == 2:
        acc_ref[...] += jnp.sum(diff * diff, axis=-1, keepdims=True)
    else:  # p == 1
        acc_ref[...] += jnp.sum(jnp.abs(diff), axis=-1, keepdims=True)

    @pl.when(j == pl.num_programs(1) - 1)
    def _finalize():
        if p == 2:
            o_ref[...] = jnp.sqrt(acc_ref[...])
        else:
            o_ref[...] = acc_ref[...]


def _cosine_sim_kernel(x1_ref, x2_ref, o_ref, xy_ref, xx_ref, yy_ref, *, eps):
    """CosineSimilarity over the feature axis; zero-padded columns contribute 0 to all sums."""
    j = pl.program_id(1)

    @pl.when(j == 0)
    def _init():
        xy_ref[...] = jnp.zeros_like(xy_ref)
        xx_ref[...] = jnp.zeros_like(xx_ref)
        yy_ref[...] = jnp.zeros_like(yy_ref)

    a = x1_ref[...].astype(jnp.float32)
    b = x2_ref[...].astype(jnp.float32)
    xy_ref[...] += jnp.sum(a * b, axis=-1, keepdims=True)
    xx_ref[...] += jnp.sum(a * a, axis=-1, keepdims=True)
    yy_ref[...] += jnp.sum(b * b, axis=-1, keepdims=True)

    @pl.when(j == pl.num_programs(1) - 1)
    def _finalize():
        # matches ATen: x1.x2 / sqrt(max(||x1||^2 * ||x2||^2, eps^2))
        denom = jnp.sqrt(jnp.maximum(xx_ref[...] * yy_ref[...], eps * eps))
        o_ref[...] = xy_ref[...] / denom


# ---------------------------------------------------------------------------
# Wrappers
# ---------------------------------------------------------------------------
def _round_up(x, m):
    return (x + m - 1) // m * m


def _tile_and_pad(x1, x2, block_rows, block_cols):
    n, d = x1.shape
    tn = min(block_rows, _round_up(n, 8))      # sublane multiple
    td = min(block_cols, _round_up(d, 128))    # lane-dense multiple of 128
    n_pad = _round_up(n, tn)
    d_pad = _round_up(d, td)
    if (n_pad, d_pad) != (n, d):
        x1 = jnp.pad(x1, ((0, n_pad - n), (0, d_pad - d)))
        x2 = jnp.pad(x2, ((0, n_pad - n), (0, d_pad - d)))
    return x1, x2, tn, td, (n_pad // tn, d_pad // td)


def _run_rowwise_reduce(kernel, x1p, x2p, tn, td, grid, n_scratch, cost):
    n_pad = x1p.shape[0]
    in_spec = pl.BlockSpec((tn, td), lambda i, j: (i, j))
    return pl.pallas_call(
        kernel,
        out_shape=jax.ShapeDtypeStruct((n_pad, 1), jnp.float32),
        grid=grid,
        in_specs=[in_spec, in_spec],
        out_specs=pl.BlockSpec((tn, 1), lambda i, j: (i, 0)),  # resident across reduction axis
        scratch_shapes=[pltpu.VMEM((tn, 1), jnp.float32)] * n_scratch,
        compiler_params=pltpu.CompilerParams(
            dimension_semantics=("parallel", "arbitrary")),
        cost_estimate=cost,
    )(x1p, x2p)


def pairwise_distance(x1, x2, *, p=2, eps=1e-6, block_rows=256, block_cols=512):
    assert x1.shape == x2.shape
    batch_shape = x1.shape[:-1]
    d = x1.shape[-1]
    x1 = x1.reshape(-1, d)
    x2 = x2.reshape(-1, d)
    n = x1.shape[0]
    x1p, x2p, tn, td, grid = _tile_and_pad(x1, x2, block_rows, block_cols)
    kernel = functools.partial(
        _pnorm_dist_kernel, p=p, eps=eps, valid_cols=d, block_cols=td)
    cost = pl.CostEstimate(
        flops=3 * n * d,
        transcendentals=n,
        bytes_accessed=2 * n * d * x1.dtype.itemsize + n * 4)
    out = _run_rowwise_reduce(kernel, x1p, x2p, tn, td, grid, 1, cost)
    return out[:n, 0].reshape(batch_shape)  # keepdim=False


def cosine_similarity(x1, x2, *, eps=1e-8, block_rows=256, block_cols=512):
    assert x1.shape == x2.shape and x1.ndim == 2, "cosine kernel expects (N, D) inputs"
    n, d = x1.shape
    x1p, x2p, tn, td, grid = _tile_and_pad(x1, x2, block_rows, block_cols)
    kernel = functools.partial(_cosine_sim_kernel, eps=eps)
    cost = pl.CostEstimate(
        flops=6 * n * d,
        transcendentals=n,
        bytes_accessed=2 * n * d * x1.dtype.itemsize + n * 4)
    out = _run_rowwise_reduce(kernel, x1p, x2p, tn, td, grid, 3, cost)
    return out[:n, 0]


def siamese_forward(x1, x2, distance_type=None, *, block_rows=256, block_cols=512):
    """Forward pass of the PyTorch `Siamese` module."""
    if distance_type == "cosine":
        return cosine_similarity(x1, x2, block_rows=block_rows, block_cols=block_cols)
    p = 1 if distance_type == "abs" else 2  # 'euclidian' / None / anything else -> p=2
    return pairwise_distance(x1, x2, p=p, block_rows=block_rows, block_cols=block_cols)


# ---------------------------------------------------------------------------
if __name__ == "__main__":
    key = jax.random.PRNGKey(0)
    k1, k2 = jax.random.split(key)

    # (batch, feature) embeddings. D is deliberately not a multiple of 128 so the
    # padded/masked reduction path runs; small tiles exercise the full 2-D grid.
    N, D = 16, 200
    x1 = jax.random.normal(k1, (N, D), jnp.float32)
    x2 = jax.random.normal(k2, (N, D), jnp.float32)

    run = functools.partial(siamese_forward, block_rows=8, block_cols=128)

    out = jax.jit(lambda a, b: run(a, b))(x1, x2)                           # default: p=2
    out_abs = jax.jit(lambda a, b: run(a, b, distance_type="abs"))(x1, x2)
    out_cos = jax.jit(lambda a, b: run(a, b, distance_type="cosine"))(x1, x2)
    jax.block_until_ready((out, out_abs, out_cos))

    assert out.shape == (N,) and out_abs.shape == (N,) and out_cos.shape == (N,)

    # Pure-JAX references (exact PyTorch formulas).
    ref_l2 = jnp.sqrt(jnp.sum((x1 - x2 + 1e-6) ** 2, axis=-1))
    ref_l1 = jnp.sum(jnp.abs(x1 - x2 + 1e-6), axis=-1)
    w12 = jnp.sum(x1 * x2, axis=-1)
    w1 = jnp.sum(x1 * x1, axis=-1)
    w2 = jnp.sum(x2 * x2, axis=-1)
    ref_cos = w12 / jnp.sqrt(jnp.maximum(w1 * w2, 1e-8 ** 2))

    assert jnp.allclose(out, ref_l2, rtol=1e-4, atol=1e-5)
    assert jnp.allclose(out_abs, ref_l1, rtol=1e-4, atol=1e-5)
    assert jnp.allclose(out_cos, ref_cos, rtol=1e-4, atol=1e-5)

    print("KERNEL_OK")
</pallas_src>

<mosaic_0001>
module attributes {stable_mosaic.version = 11 : i64} {
  func.func @_pnorm_dist_kernel(%arg0: i32, %arg1: i32, %arg2: memref<8x128xf32, #tpu.memory_space<vmem>>, %arg3: memref<8x128xf32, #tpu.memory_space<vmem>>, %arg4: memref<8x1xf32, #tpu.memory_space<vmem>>, %arg5: memref<8x1xf32, #tpu.memory_space<vmem>>) attributes {dimension_semantics = [#tpu.dimension_semantics<parallel>, #tpu.dimension_semantics<arbitrary>], iteration_bounds = array<i64: 2, 2>, scalar_prefetch = 0 : i64, scratch_operands = 1 : i64, tpu.core_type = #tpu.core_type<tc>, window_params = [{transform_indices = @transform_0, window_bounds = array<i64: 8, 128>}, {transform_indices = @transform_1, window_bounds = array<i64: 8, 128>}, {transform_indices = @transform_2, window_bounds = array<i64: 8, 1>}]} {
    %c0_i32 = arith.constant 0 : i32
    %0 = arith.cmpi eq, %arg1, %c0_i32 : i32
    %1 = arith.extui %0 : i1 to i32
    %c0_i32_0 = arith.constant 0 : i32
    %2 = arith.cmpi ne, %1, %c0_i32_0 : i32
    scf.if %2 {
      %cst_11 = arith.constant 0.000000e+00 : f32
      %25 = vector.broadcast %cst_11 : f32 to vector<8x1xf32>
      %c0_12 = arith.constant 0 : index
      %c0_13 = arith.constant 0 : index
      %26 = vector.load %arg5[%c0_12, %c0_13] : memref<8x1xf32, #tpu.memory_space<vmem>>, vector<8x1xf32>
      tpu.vector_store %arg5[%c0_12, %c0_13], %25 {strides = array<i32>} : memref<8x1xf32, #tpu.memory_space<vmem>>, vector<8x1xf32>,
    } else {
    }
    %c0 = arith.constant 0 : index
    %c0_1 = arith.constant 0 : index
    %3 = vector.load %arg2[%c0, %c0_1] : memref<8x128xf32, #tpu.memory_space<vmem>>, vector<8x128xf32>
    %c0_2 = arith.constant 0 : index
    %c0_3 = arith.constant 0 : index
    %4 = vector.load %arg3[%c0_2, %c0_3] : memref<8x128xf32, #tpu.memory_space<vmem>>, vector<8x128xf32>
    %5 = arith.subf %3, %4 : vector<8x128xf32>
    %cst = arith.constant 9.99999997E-7 : f32
    %6 = vector.broadcast %cst : f32 to vector<8x128xf32>
    %7 = arith.addf %5, %6 : vector<8x128xf32>
    %c128_i32 = arith.constant 128 : i32
    %8 = arith.muli %arg1, %c128_i32 : i32
    %9 = tpu.iota {dimensions = array<i32: 1>} : vector<8x128xi32>
    %10 = vector.broadcast %8 : i32 to vector<8x128xi32>
    %11 = arith.addi %10, %9 : vector<8x128xi32>
    %c200_i32 = arith.constant 200 : i32
    %12 = vector.broadcast %c200_i32 : i32 to vector<8x128xi32>
    %13 = arith.cmpi slt, %11, %12 : vector<8x128xi32>
    %cst_4 = arith.constant 0.000000e+00 : f32
    %14 = vector.broadcast %cst_4 : f32 to vector<8x128xf32>
    %15 = arith.select %13, %7, %14 : vector<8x128xi1>, vector<8x128xf32>
    %c0_5 = arith.constant 0 : index
    %c0_6 = arith.constant 0 : index
    %16 = vector.load %arg5[%c0_5, %c0_6] : memref<8x1xf32, #tpu.memory_space<vmem>>, vector<8x1xf32>
    %17 = arith.mulf %15, %15 : vector<8x128xf32>
    %cst_7 = arith.constant dense<0.000000e+00> : vector<8xf32>
    %18 = vector.multi_reduction <add>, %17, %cst_7 [1] : vector<8x128xf32> to vector<8xf32>
    %19 = vector.shape_cast %18 : vector<8xf32> to vector<8x1xf32>
    %20 = arith.addf %16, %19 : vector<8x1xf32>
    %c0_8 = arith.constant 0 : index
    %c0_9 = arith.constant 0 : index
    %21 = vector.load %arg5[%c0_8, %c0_9] : memref<8x1xf32, #tpu.memory_space<vmem>>, vector<8x1xf32>
    tpu.vector_store %arg5[%c0_8, %c0_9], %20 {strides = array<i32>} : memref<8x1xf32, #tpu.memory_space<vmem>>, vector<8x1xf32>,
    %c1_i32 = arith.constant 1 : i32
    %22 = arith.cmpi eq, %arg1, %c1_i32 : i32
    %23 = arith.extui %22 : i1 to i32
    %c0_i32_10 = arith.constant 0 : i32
    %24 = arith.cmpi ne, %23, %c0_i32_10 : i32
    scf.if %24 {
      %c0_11 = arith.constant 0 : index
      %c0_12 = arith.constant 0 : index
      %25 = vector.load %arg5[%c0_11, %c0_12] : memref<8x1xf32, #tpu.memory_space<vmem>>, vector<8x1xf32>
      %26 = math.sqrt %25 : vector<8x1xf32>
      %c0_13 = arith.constant 0 : index
      %c0_14 = arith.constant 0 : index
      %27 = vector.load %arg4[%c0_13, %c0_14] : memref<8x1xf32, #tpu.memory_space<vmem>>, vector<8x1xf32>
      tpu.vector_store %arg4[%c0_13, %c0_14], %26 {strides = array<i32>} : memref<8x1xf32, #tpu.memory_space<vmem>>, vector<8x1xf32>,
    } else {
    }
    return
  }
  func.func @transform_0(%arg0: i32, %arg1: i32) -> (i32, i32) {
    %c0_i32 = arith.constant 0 : i32
    return %arg0, %arg1 : i32, i32
  }
  func.func @transform_1(%arg0: i32, %arg1: i32) -> (i32, i32) {
    %c0_i32 = arith.constant 0 : i32
    return %arg0, %arg1 : i32, i32
  }
  func.func @transform_2(%arg0: i32, %arg1: i32) -> (i32, i32) {
    %c0_i32 = arith.constant 0 : i32
    %c0_i32_0 = arith.constant 0 : i32
    return %arg0, %c0_i32 : i32, i32
  }
}

</mosaic_0001>

<bundles_post_ra>
// kernel: _lambda_.1
= control target key start
LH: loop header
LB: loop body
LE: loop exit
PB: predicated region body
PF: predicated region fallthrough
CT: control target
= control target key end

     0   :  { %s435_s9 = smov 0   ;;  %s437_s10 = smov 0   ;;  %s499_s0 = inlined_call_operand.vmem [shape: f32[16,256], index: 0, kind: input, shape index: {}]   ;;  %s500_s1 = inlined_call_operand.vmem [shape: f32[16,256], index: 1, kind: input, shape index: {}]   ;;  %s501_s2 = inlined_call_operand.vmem [shape: f32[16,1], index: 2, kind: output, shape index: {}]  }
   0x1   :  { %s439_s11 = smov 0   ;;  %s441_s12 = smov 0  }
   0x2   :  { %s443_s13 = smov 0  }
   0x3 LB: > { %s21_s14 = sadd.s32 1, %s409_s11  ;;  %s24_s15 = sadd.s32 1, %s413_s12  ;;  %s417_s13 = sphi %s443_s13, %s12_s13   ;;  %s413_s12 = sphi %s441_s12, %s505_s12   ;;  %s409_s11 = sphi %s439_s11, %s504_s11   ;;  %s405_s10 = sphi %s437_s10, %s503_s10   ;;  %s401_s9 = sphi %s435_s9, %s502_s9  }
   0x4   : > { %p22_p0 = scmp.ge.s32.totalorder %s21_s14, 2  ;;  %p325_p1 = scmp.ge.s32.totalorder %s417_s13, 1 }
   0x5   : > { %p144_p2 = scmp.lt.s32.totalorder %s417_s13, 5 }
   0x6   : > { %s507_s14 = smov (%p22_p0, %s21_s14), 0  ;;  %s509_s15 = smov (!%p22_p0, %s24_s15), %s413_s12 }
   0x7   : > { %p145_p3 = pnand %p325_p1, %p144_p2  ;;  %p26_p4 = scmp.ge.s32.totalorder %s509_s15, 2 }
   0x8   : > { %p176_p5 = scmp.lt.s32.totalorder (!%p145_p3), %s405_s10, 1  ;;  %p178_p6 = scmp.lt.s32.totalorder (!%p145_p3), %s401_s9, 1 }
   0x9   : > { %s511_s15 = smov (%p26_p4, %s509_s15), 0  ;;  %148 = sbr.rel (%p145_p3) target bundleno = 202 (0xca), region = 28 }
   0xa   : > { %p331_p7 = scmp.ne.s32.totalorder (!%p145_p3), %s401_s9, 0 }
   0xe   : > { %s513_s10 = smov (!%p176_p5, %s405_s10), 1 }
   0xf   : > { %s179_s16 = scalar_select %p178_p6, %s401_s9, 1 }
  0x10   : > { %s326_s17 = sshll.u32 %s513_s10, 1  ;;  %s330_s18 = sshll.u32 %s513_s10, 3 }
  0x11   : > { %s181_s19 = sadd.s32 %s326_s17, %s179_s16  ;;  %s472_s22 = scalar_lea.vmem %s501_s2, %s330_s18 }
  0x12   : > { %s327_s23 = sshll.u32 %s181_s19, 3  ;;  %199 = sbr.rel (%p331_p7) target bundleno = 25 (0x19), region = 32 }
  0x13   : > { %s183_s26 = scalar_lea.vmem %s499_s0, %s327_s23  ;;  %s191_s29 = scalar_lea.vmem %s500_s1, %s327_s23 }
  0x17   : > { %vm200_vm0 = vcmask 7168   ;;  %v419_v0 = vmov 0.0  }
  0x18   : > { %201 = vst.msk [vmem:[#allocation2] sm:$0xff] %vm200_vm0, %v419_v0 }
  0x19 PF: > { %v202_v1 = vld [vmem:[%s183_s26] sm:$0xff]  ;;  %s332_s30 = sshll.u32 %s401_s9, 7  ;;  %v207_v3 = vlaneseq  ;;  %vm218_vm2 = vcmask 7168   ;;  %p333_p8 = scmp.ne.s32.totalorder %s401_s9, 1 }
  0x1a   : > { %v203_v2 = vld [vmem:[%s191_s29] sm:$0xff]  ;;  %v209_v5 = vstv %s332_s30 }
  0x1b   : > { %v204_v4 = vsub.f32 %v202_v1, %v203_v2  ;;  %v208_v6 = vand.u32 127, %v207_v3 }
  0x1d   : > { %v205_v7 = vadd.f32 1e-06, %v204_v4  ;;  %v210_v8 = vadd.s32 %v209_v5, %v208_v6 }
  0x1f   : > { %vm211_vm1 = vcmp.lt.s32.totalorder %v210_v8, 200  ;;  %v213_v11 = vld [vmem:[#allocation2] sm:$0xff] }
  0x20   : > { %v212_v9 = vsel %vm211_vm1, %v205_v7, 0.0 }
  0x21   : > { %v214_v10 = vmul.f32 %v212_v9, %v212_v9 }
  0x23   : > { %215 = vadd.xlane.f32.xlu0 %v214_v10 }
  0xab   : > { %223 = sbr.rel (%p333_p8) target bundleno = 202 (0xca), region = 36 }
  0xac   : > { %v216_v12 = vpop.xlane.xlu0 %215 }
  0xad   : > { %v217_v13 = vadd.f32 %v216_v12, %v213_v11 }
  0xaf   : > { %219 = vst.msk [vmem:[#allocation2] sm:$0xff] %vm218_vm2, %v217_v13 }
  0xb6   : > { %v224_v14 = vld [vmem:[#allocation2] sm:$0xff] }
  0xb7   : > { %377 = vrsqrt.f32 %v224_v14  ;;  %vm227_vm3 = vcmp.eq.f32.partialorder %v224_v14, inf  ;;  %v230_v16 = vand.u32 2147483648, %v224_v14  ;;  %vm229_vm4 = vcmp.eq.f32.partialorder %v224_v14, 0.0 }
  0xc4   : > { %v378_v15 = vpop.eup %377 }
  0xc5   : > { %v226_v17 = vmul.f32 %v378_v15, %v224_v14 }
  0xc7   : > { %v228_v18 = vsel %vm227_vm3, %v224_v14, %v226_v17 }
  0xc8   : > { %v231_v19 = vsel %vm229_vm4, %v230_v16, %v228_v18 }
  0xc9   : > { %232 = vst.msk [vmem:[%s472_s22] sm:$0xff] %vm218_vm2, %v231_v19 }
  0xca PF: > { %s12_s13 = sadd.s32 1, %s417_s13   ;;  %s502_s9 = smov %s409_s11 }
  0xcb   : > { %p9_p9 = scmp.ge.s32.totalorder %s12_s13, 6   ;;  %s503_s10 = smov %s413_s12 }
  0xcc   : > { %s504_s11 = smov %s507_s14  ;;  %s505_s12 = smov %s511_s15 }
  0xcd   :  { %11 = sbr.rel (!%p9_p9) target bundleno = 3 (0x3), region = 69 }

</bundles_post_ra>
